<compile_context>
chip_gen: v6e
topology: v6e:2x2x1
jax: 0.10.0
libtpu: 0.0.40
codegen_flags: <defaults>
</compile_context>

<pallas_src>
import functools

import jax
import jax.numpy as jnp
from jax.experimental import pallas as pl
from jax.experimental.pallas import tpu as pltpu


def _yolo_kernel(anchors_ref, grid_ref, pred_ref, out_ref, *, nA, stride):
    """One batch: pred_ref/out_ref are (nA, C, S); grid_ref is (2, S)."""
    s = jnp.float32(stride)
    go = grid_ref[...]                                   # (2, S): row0 = gx, row1 = gy

    # rows 0:2  — box centers: (sigmoid(tx/ty) + grid offset) * stride
    out_ref[:, 0:2, :] = (jax.nn.sigmoid(pred_ref[:, 0:2, :]) + go[None, :, :]) * s

    # rows 2:4  — box sizes: exp(tw/th) * anchor_{w,h}
    # (anchors_ref already holds scaled_anchor * stride; per-anchor scalars
    #  come from SMEM, nA is tiny so a static Python loop is fine.)
    for a in range(nA):
        out_ref[a, 2:3, :] = jnp.exp(pred_ref[a, 2:3, :]) * anchors_ref[a, 0]
        out_ref[a, 3:4, :] = jnp.exp(pred_ref[a, 3:4, :]) * anchors_ref[a, 1]

    # rows 4:   — objectness + class scores: sigmoid
    out_ref[:, 4:, :] = jax.nn.sigmoid(pred_ref[:, 4:, :])


def yolo_forward(x, anchors, num_classes, img_dim):
    """x: (nB, nA*(5+num_classes), nG, nG) float32 (NCHW conv output)."""
    nB, ch, nG, nG2 = x.shape
    assert nG == nG2
    nA = int(anchors.shape[0])
    C = 5 + num_classes
    assert ch == nA * C, "channel dim must equal nA * (5 + num_classes)"
    S = nG * nG
    stride = float(img_dim) / float(nG)

    # Channel-major view — a free reshape, NOT a transpose (saves one full HBM pass).
    pred = x.reshape(nB, nA, C, S).astype(jnp.float32)

    # Small constant operands precomputed once in the wrapper.
    scaled_anchors = anchors.astype(jnp.float32) / jnp.float32(stride)     # (nA, 2)
    anch = scaled_anchors * jnp.float32(stride)                            # folded * stride
    sidx = jnp.arange(S, dtype=jnp.int32)
    grid_off = jnp.stack([(sidx % nG).astype(jnp.float32),                 # gx
                          (sidx // nG).astype(jnp.float32)], axis=0)       # gy  -> (2, S)

    kernel = functools.partial(_yolo_kernel, nA=nA, stride=stride)

    # Input + output block, double-buffered, plus slack; capped for v7x's 64 MiB VMEM.
    block_bytes = nA * C * S * 4
    vmem_limit = int(min(max(4 * block_bytes + (2 << 20), 16 << 20), 64 << 20))

    out = pl.pallas_call(
        kernel,
        out_shape=jax.ShapeDtypeStruct((nB, nA, C, S), jnp.float32),
        grid=(nB,),
        in_specs=[
            pl.BlockSpec(memory_space=pltpu.MemorySpace.SMEM),          # anchors (nA, 2)
            pl.BlockSpec((2, S), lambda b: (0, 0)),                     # grid offsets
            pl.BlockSpec((None, nA, C, S), lambda b: (b, 0, 0, 0)),     # predictions
        ],
        out_specs=pl.BlockSpec((None, nA, C, S), lambda b: (b, 0, 0, 0)),
        compiler_params=pltpu.CompilerParams(
            dimension_semantics=("parallel",),
            vmem_limit_bytes=vmem_limit),
    )(anch, grid_off, pred)

    # Single cheap XLA transpose at the very end to match torch's
    # cat(boxes.view(nB,-1,4)*stride, conf.view(nB,-1,1), cls.view(nB,-1,nc)).
    return out.transpose(0, 1, 3, 2).reshape(nB, nA * S, C)


def yolo_reference(x, anchors, num_classes, img_dim):
    """Pure-JAX reference of the PyTorch forward (targets=None)."""
    nB, _, nG, _ = x.shape
    nA = anchors.shape[0]
    C = 5 + num_classes
    stride = img_dim / nG
    pred = x.reshape(nB, nA, C, nG, nG).transpose(0, 1, 3, 4, 2).astype(jnp.float32)
    sx = jax.nn.sigmoid(pred[..., 0])
    sy = jax.nn.sigmoid(pred[..., 1])
    w = pred[..., 2]
    h = pred[..., 3]
    conf = jax.nn.sigmoid(pred[..., 4])
    cls = jax.nn.sigmoid(pred[..., 5:])
    gx = jnp.arange(nG, dtype=jnp.float32).reshape(1, 1, 1, nG)
    gy = jnp.arange(nG, dtype=jnp.float32).reshape(1, 1, nG, 1)
    sa = (anchors / stride).astype(jnp.float32)
    aw = sa[:, 0].reshape(1, nA, 1, 1)
    ah = sa[:, 1].reshape(1, nA, 1, 1)
    boxes = jnp.stack([sx + gx, sy + gy, jnp.exp(w) * aw, jnp.exp(h) * ah], axis=-1)
    return jnp.concatenate(
        [boxes.reshape(nB, -1, 4) * stride,
         conf.reshape(nB, -1, 1),
         cls.reshape(nB, -1, num_classes)],
        axis=-1)


if __name__ == "__main__":
    # Small, YOLO-consistent config: 3 anchors, 4 classes -> 27 channels.
    anchors = jnp.array([(10.0, 13.0), (16.0, 30.0), (33.0, 23.0)], dtype=jnp.float32)
    num_classes = 4
    img_dim = 64
    nB, nG = 2, 16
    nA = anchors.shape[0]
    C = 5 + num_classes

    key = jax.random.PRNGKey(0)
    x = jax.random.normal(key, (nB, nA * C, nG, nG), dtype=jnp.float32)

    out = yolo_forward(x, anchors, num_classes, img_dim)
    out = jax.block_until_ready(out)

    ref = yolo_reference(x, anchors, num_classes, img_dim)
    assert out.shape == (nB, nA * nG * nG, C), out.shape
    assert jnp.allclose(out, ref, atol=1e-5, rtol=1e-5), "mismatch vs reference"

    print("KERNEL_OK")
</pallas_src>

<mosaic_0001>
module attributes {stable_mosaic.version = 11 : i64} {
  func.func @_yolo_kernel(%arg0: i32, %arg1: memref<3x2xf32, #tpu.memory_space<smem>>, %arg2: memref<2x256xf32, #tpu.memory_space<vmem>>, %arg3: memref<1x3x9x256xf32, #tpu.memory_space<vmem>>, %arg4: memref<1x3x9x256xf32, #tpu.memory_space<vmem>>) attributes {dimension_semantics = [#tpu.dimension_semantics<parallel>], iteration_bounds = array<i64: 2>, scalar_prefetch = 0 : i64, scratch_operands = 0 : i64, tpu.core_type = #tpu.core_type<tc>, window_params = [{transform_indices = @transform_0, window_bounds = array<i64: 3, 2>}, {pipeline_mode = #tpu.pipeline_mode<synchronous>, transform_indices = @transform_1, window_bounds = array<i64: 2, 256>}, {transform_indices = @transform_2, window_bounds = array<i64: 1, 3, 9, 256>}, {transform_indices = @transform_3, window_bounds = array<i64: 1, 3, 9, 256>}]} {
    %c0 = arith.constant 0 : index
    %c0_0 = arith.constant 0 : index
    %0 = vector.load %arg2[%c0, %c0_0] : memref<2x256xf32, #tpu.memory_space<vmem>>, vector<2x256xf32>
    %c0_1 = arith.constant 0 : index
    %c0_2 = arith.constant 0 : index
    %c0_3 = arith.constant 0 : index
    %c0_4 = arith.constant 0 : index
    %1 = vector.load %arg3[%c0_1, %c0_2, %c0_3, %c0_4] : memref<1x3x9x256xf32, #tpu.memory_space<vmem>>, vector<1x3x2x256xf32>
    %2 = vector.shape_cast %1 : vector<1x3x2x256xf32> to vector<3x2x256xf32>
    %3 = arith.negf %2 : vector<3x2x256xf32>
    %4 = math.exp %3 : vector<3x2x256xf32>
    %cst = arith.constant 1.000000e+00 : f32
    %5 = vector.broadcast %cst : f32 to vector<3x2x256xf32>
    %6 = arith.addf %5, %4 : vector<3x2x256xf32>
    %7 = arith.divf %5, %6 : vector<3x2x256xf32>
    %8 = vector.shape_cast %0 : vector<2x256xf32> to vector<1x2x256xf32>
    %9 = vector.broadcast %8 : vector<1x2x256xf32> to vector<3x2x256xf32>
    %10 = arith.addf %7, %9 : vector<3x2x256xf32>
    %cst_5 = arith.constant 4.000000e+00 : f32
    %11 = vector.broadcast %cst_5 : f32 to vector<3x2x256xf32>
    %12 = arith.mulf %10, %11 : vector<3x2x256xf32>
    %c0_6 = arith.constant 0 : index
    %c0_7 = arith.constant 0 : index
    %c0_8 = arith.constant 0 : index
    %c0_9 = arith.constant 0 : index
    %13 = vector.load %arg4[%c0_6, %c0_7, %c0_8, %c0_9] : memref<1x3x9x256xf32, #tpu.memory_space<vmem>>, vector<1x3x2x256xf32>
    %14 = vector.shape_cast %13 : vector<1x3x2x256xf32> to vector<3x2x256xf32>
    %15 = vector.shape_cast %12 : vector<3x2x256xf32> to vector<1x3x2x256xf32>
    tpu.vector_store %arg4[%c0_6, %c0_7, %c0_8, %c0_9], %15 {strides = array<i32>} : memref<1x3x9x256xf32, #tpu.memory_space<vmem>>, vector<1x3x2x256xf32>,
    %c0_10 = arith.constant 0 : index
    %c0_11 = arith.constant 0 : index
    %c2 = arith.constant 2 : index
    %c0_12 = arith.constant 0 : index
    %16 = vector.load %arg3[%c0_10, %c0_11, %c2, %c0_12] : memref<1x3x9x256xf32, #tpu.memory_space<vmem>>, vector<1x1x1x256xf32>
    %17 = vector.shape_cast %16 : vector<1x1x1x256xf32> to vector<1x256xf32>
    %18 = math.exp %17 : vector<1x256xf32>
    %c0_13 = arith.constant 0 : index
    %c0_14 = arith.constant 0 : index
    %19 = memref.load %arg1[%c0_13, %c0_14] : memref<3x2xf32, #tpu.memory_space<smem>>
    %20 = vector.broadcast %19 : f32 to vector<1x256xf32>
    %21 = arith.mulf %18, %20 : vector<1x256xf32>
    %c0_15 = arith.constant 0 : index
    %c0_16 = arith.constant 0 : index
    %c2_17 = arith.constant 2 : index
    %c0_18 = arith.constant 0 : index
    %22 = vector.load %arg4[%c0_15, %c0_16, %c2_17, %c0_18] : memref<1x3x9x256xf32, #tpu.memory_space<vmem>>, vector<1x1x1x256xf32>
    %23 = vector.shape_cast %22 : vector<1x1x1x256xf32> to vector<1x256xf32>
    %24 = vector.shape_cast %21 : vector<1x256xf32> to vector<1x1x1x256xf32>
    tpu.vector_store %arg4[%c0_15, %c0_16, %c2_17, %c0_18], %24 {strides = array<i32>} : memref<1x3x9x256xf32, #tpu.memory_space<vmem>>, vector<1x1x1x256xf32>,
    %c0_19 = arith.constant 0 : index
    %c0_20 = arith.constant 0 : index
    %c3 = arith.constant 3 : index
    %c0_21 = arith.constant 0 : index
    %25 = vector.load %arg3[%c0_19, %c0_20, %c3, %c0_21] : memref<1x3x9x256xf32, #tpu.memory_space<vmem>>, vector<1x1x1x256xf32>
    %26 = vector.shape_cast %25 : vector<1x1x1x256xf32> to vector<1x256xf32>
    %27 = math.exp %26 : vector<1x256xf32>
    %c0_22 = arith.constant 0 : index
    %c1 = arith.constant 1 : index
    %28 = memref.load %arg1[%c0_22, %c1] : memref<3x2xf32, #tpu.memory_space<smem>>
    %29 = vector.broadcast %28 : f32 to vector<1x256xf32>
    %30 = arith.mulf %27, %29 : vector<1x256xf32>
    %c0_23 = arith.constant 0 : index
    %c0_24 = arith.constant 0 : index
    %c3_25 = arith.constant 3 : index
    %c0_26 = arith.constant 0 : index
    %31 = vector.load %arg4[%c0_23, %c0_24, %c3_25, %c0_26] : memref<1x3x9x256xf32, #tpu.memory_space<vmem>>, vector<1x1x1x256xf32>
    %32 = vector.shape_cast %31 : vector<1x1x1x256xf32> to vector<1x256xf32>
    %33 = vector.shape_cast %30 : vector<1x256xf32> to vector<1x1x1x256xf32>
    tpu.vector_store %arg4[%c0_23, %c0_24, %c3_25, %c0_26], %33 {strides = array<i32>} : memref<1x3x9x256xf32, #tpu.memory_space<vmem>>, vector<1x1x1x256xf32>,
    %c0_27 = arith.constant 0 : index
    %c1_28 = arith.constant 1 : index
    %c2_29 = arith.constant 2 : index
    %c0_30 = arith.constant 0 : index
    %34 = vector.load %arg3[%c0_27, %c1_28, %c2_29, %c0_30] : memref<1x3x9x256xf32, #tpu.memory_space<vmem>>, vector<1x1x1x256xf32>
    %35 = vector.shape_cast %34 : vector<1x1x1x256xf32> to vector<1x256xf32>
    %36 = math.exp %35 : vector<1x256xf32>
    %c1_31 = arith.constant 1 : index
    %c0_32 = arith.constant 0 : index
    %37 = memref.load %arg1[%c1_31, %c0_32] : memref<3x2xf32, #tpu.memory_space<smem>>
    %38 = vector.broadcast %37 : f32 to vector<1x256xf32>
    %39 = arith.mulf %36, %38 : vector<1x256xf32>
    %c0_33 = arith.constant 0 : index
    %c1_34 = arith.constant 1 : index
    %c2_35 = arith.constant 2 : index
    %c0_36 = arith.constant 0 : index
    %40 = vector.load %arg4[%c0_33, %c1_34, %c2_35, %c0_36] : memref<1x3x9x256xf32, #tpu.memory_space<vmem>>, vector<1x1x1x256xf32>
    %41 = vector.shape_cast %40 : vector<1x1x1x256xf32> to vector<1x256xf32>
    %42 = vector.shape_cast %39 : vector<1x256xf32> to vector<1x1x1x256xf32>
    tpu.vector_store %arg4[%c0_33, %c1_34, %c2_35, %c0_36], %42 {strides = array<i32>} : memref<1x3x9x256xf32, #tpu.memory_space<vmem>>, vector<1x1x1x256xf32>,
    %c0_37 = arith.constant 0 : index
    %c1_38 = arith.constant 1 : index
    %c3_39 = arith.constant 3 : index
    %c0_40 = arith.constant 0 : index
    %43 = vector.load %arg3[%c0_37, %c1_38, %c3_39, %c0_40] : memref<1x3x9x256xf32, #tpu.memory_space<vmem>>, vector<1x1x1x256xf32>
    %44 = vector.shape_cast %43 : vector<1x1x1x256xf32> to vector<1x256xf32>
    %45 = math.exp %44 : vector<1x256xf32>
    %c1_41 = arith.constant 1 : index
    %c1_42 = arith.constant 1 : index
    %46 = memref.load %arg1[%c1_41, %c1_42] : memref<3x2xf32, #tpu.memory_space<smem>>
    %47 = vector.broadcast %46 : f32 to vector<1x256xf32>
    %48 = arith.mulf %45, %47 : vector<1x256xf32>
    %c0_43 = arith.constant 0 : index
    %c1_44 = arith.constant 1 : index
    %c3_45 = arith.constant 3 : index
    %c0_46 = arith.constant 0 : index
    %49 = vector.load %arg4[%c0_43, %c1_44, %c3_45, %c0_46] : memref<1x3x9x256xf32, #tpu.memory_space<vmem>>, vector<1x1x1x256xf32>
    %50 = vector.shape_cast %49 : vector<1x1x1x256xf32> to vector<1x256xf32>
    %51 = vector.shape_cast %48 : vector<1x256xf32> to vector<1x1x1x256xf32>
    tpu.vector_store %arg4[%c0_43, %c1_44, %c3_45, %c0_46], %51 {strides = array<i32>} : memref<1x3x9x256xf32, #tpu.memory_space<vmem>>, vector<1x1x1x256xf32>,
    %c0_47 = arith.constant 0 : index
    %c2_48 = arith.constant 2 : index
    %c2_49 = arith.constant 2 : index
    %c0_50 = arith.constant 0 : index
    %52 = vector.load %arg3[%c0_47, %c2_48, %c2_49, %c0_50] : memref<1x3x9x256xf32, #tpu.memory_space<vmem>>, vector<1x1x1x256xf32>
    %53 = vector.shape_cast %52 : vector<1x1x1x256xf32> to vector<1x256xf32>
    %54 = math.exp %53 : vector<1x256xf32>
    %c2_51 = arith.constant 2 : index
    %c0_52 = arith.constant 0 : index
    %55 = memref.load %arg1[%c2_51, %c0_52] : memref<3x2xf32, #tpu.memory_space<smem>>
    %56 = vector.broadcast %55 : f32 to vector<1x256xf32>
    %57 = arith.mulf %54, %56 : vector<1x256xf32>
    %c0_53 = arith.constant 0 : index
    %c2_54 = arith.constant 2 : index
    %c2_55 = arith.constant 2 : index
    %c0_56 = arith.constant 0 : index
    %58 = vector.load %arg4[%c0_53, %c2_54, %c2_55, %c0_56] : memref<1x3x9x256xf32, #tpu.memory_space<vmem>>, vector<1x1x1x256xf32>
    %59 = vector.shape_cast %58 : vector<1x1x1x256xf32> to vector<1x256xf32>
    %60 = vector.shape_cast %57 : vector<1x256xf32> to vector<1x1x1x256xf32>
    tpu.vector_store %arg4[%c0_53, %c2_54, %c2_55, %c0_56], %60 {strides = array<i32>} : memref<1x3x9x256xf32, #tpu.memory_space<vmem>>, vector<1x1x1x256xf32>,
    %c0_57 = arith.constant 0 : index
    %c2_58 = arith.constant 2 : index
    %c3_59 = arith.constant 3 : index
    %c0_60 = arith.constant 0 : index
    %61 = vector.load %arg3[%c0_57, %c2_58, %c3_59, %c0_60] : memref<1x3x9x256xf32, #tpu.memory_space<vmem>>, vector<1x1x1x256xf32>
    %62 = vector.shape_cast %61 : vector<1x1x1x256xf32> to vector<1x256xf32>
    %63 = math.exp %62 : vector<1x256xf32>
    %c2_61 = arith.constant 2 : index
    %c1_62 = arith.constant 1 : index
    %64 = memref.load %arg1[%c2_61, %c1_62] : memref<3x2xf32, #tpu.memory_space<smem>>
    %65 = vector.broadcast %64 : f32 to vector<1x256xf32>
    %66 = arith.mulf %63, %65 : vector<1x256xf32>
    %c0_63 = arith.constant 0 : index
    %c2_64 = arith.constant 2 : index
    %c3_65 = arith.constant 3 : index
    %c0_66 = arith.constant 0 : index
    %67 = vector.load %arg4[%c0_63, %c2_64, %c3_65, %c0_66] : memref<1x3x9x256xf32, #tpu.memory_space<vmem>>, vector<1x1x1x256xf32>
    %68 = vector.shape_cast %67 : vector<1x1x1x256xf32> to vector<1x256xf32>
    %69 = vector.shape_cast %66 : vector<1x256xf32> to vector<1x1x1x256xf32>
    tpu.vector_store %arg4[%c0_63, %c2_64, %c3_65, %c0_66], %69 {strides = array<i32>} : memref<1x3x9x256xf32, #tpu.memory_space<vmem>>, vector<1x1x1x256xf32>,
    %c0_67 = arith.constant 0 : index
    %c0_68 = arith.constant 0 : index
    %c4 = arith.constant 4 : index
    %c0_69 = arith.constant 0 : index
    %70 = vector.load %arg3[%c0_67, %c0_68, %c4, %c0_69] : memref<1x3x9x256xf32, #tpu.memory_space<vmem>>, vector<1x3x5x256xf32>
    %71 = vector.shape_cast %70 : vector<1x3x5x256xf32> to vector<3x5x256xf32>
    %72 = arith.negf %71 : vector<3x5x256xf32>
    %73 = math.exp %72 : vector<3x5x256xf32>
    %cst_70 = arith.constant 1.000000e+00 : f32
    %74 = vector.broadcast %cst_70 : f32 to vector<3x5x256xf32>
    %75 = arith.addf %74, %73 : vector<3x5x256xf32>
    %76 = arith.divf %74, %75 : vector<3x5x256xf32>
    %c0_71 = arith.constant 0 : index
    %c0_72 = arith.constant 0 : index
    %c4_73 = arith.constant 4 : index
    %c0_74 = arith.constant 0 : index
    %77 = vector.load %arg4[%c0_71, %c0_72, %c4_73, %c0_74] : memref<1x3x9x256xf32, #tpu.memory_space<vmem>>, vector<1x3x5x256xf32>
    %78 = vector.shape_cast %77 : vector<1x3x5x256xf32> to vector<3x5x256xf32>
    %79 = vector.shape_cast %76 : vector<3x5x256xf32> to vector<1x3x5x256xf32>
    tpu.vector_store %arg4[%c0_71, %c0_72, %c4_73, %c0_74], %79 {strides = array<i32>} : memref<1x3x9x256xf32, #tpu.memory_space<vmem>>, vector<1x3x5x256xf32>,
    return
  }
  func.func @transform_0(%arg0: i32) -> (i32, i32) {
    %c0_i32 = arith.constant 0 : i32
    %c0_i32_0 = arith.constant 0 : i32
    %c0_i32_1 = arith.constant 0 : i32
    return %c0_i32, %c0_i32_0 : i32, i32
  }
  func.func @transform_1(%arg0: i32) -> (i32, i32) {
    %c0_i32 = arith.constant 0 : i32
    %c0_i32_0 = arith.constant 0 : i32
    %c0_i32_1 = arith.constant 0 : i32
    return %c0_i32, %c0_i32_0 : i32, i32
  }
  func.func @transform_2(%arg0: i32) -> (i32, i32, i32, i32) {
    %c0_i32 = arith.constant 0 : i32
    %c0_i32_0 = arith.constant 0 : i32
    %c0_i32_1 = arith.constant 0 : i32
    %c0_i32_2 = arith.constant 0 : i32
    return %arg0, %c0_i32, %c0_i32_0, %c0_i32_1 : i32, i32, i32, i32
  }
  func.func @transform_3(%arg0: i32) -> (i32, i32, i32, i32) {
    %c0_i32 = arith.constant 0 : i32
    %c0_i32_0 = arith.constant 0 : i32
    %c0_i32_1 = arith.constant 0 : i32
    %c0_i32_2 = arith.constant 0 : i32
    return %arg0, %c0_i32, %c0_i32_0, %c0_i32_1 : i32, i32, i32, i32
  }
}

</mosaic_0001>

<bundles_post_ra>
// kernel: tpu_custom_call.1
= control target key start
LH: loop header
LB: loop body
LE: loop exit
PB: predicated region body
PF: predicated region fallthrough
CT: control target
= control target key end

     0   :  { %8 = vsyncpa [#allocation3], 0  ;;  %s695_s12 = smov 0   ;;  %s822_s0 = inlined_call_operand.vmem [shape: f32[3,2], index: 0, kind: input, shape index: {}]   ;;  %s823_s1 = inlined_call_operand.vmem [shape: f32[2,256], index: 1, kind: input, shape index: {}]   ;;  %s824_s2 = inlined_call_operand.vmem [shape: f32[2,3,9,256], index: 2, kind: input, shape index: {}]   ;;  %s825_s3 = inlined_call_operand.vmem [shape: f32[2,3,9,256], index: 3, kind: output, shape index: {}]  }
   0x1 LB: > { %s496_s13 = sadd.s32 4294967295, %s672_s12   ;;  %p498_p0 = scmp.ge.s32.totalorder %s672_s12, 1  ;;  %s672_s12 = sphi %s695_s12, %s14_s12  }
   0x2   : > { %p113_p1 = scmp.lt.s32.totalorder %s672_s12, 3  ;;  %s126_s16 = sshll.u32 %s822_s0, 4  ;;  %s127_s16 = int_to_ptr.vmem [resolvable:$true] %s126_s16 }
   0x3   : > { %p552_p3 = scmp.eq.s32.totalorder %s496_s13, 0  ;;  %s647_s18 = scalar_lea.vmem %s127_s16, 64 }
   0x4   : > { %p706_p2 = pnand %p498_p0, %p113_p1  ;;  %p648_p6 = scmp.ne.s32.totalorder %s127_s16, %s647_s18 }
   0x5   : > { %p655_p10 = scmp.lt.s32.totalorder %s127_s16, %s127_s16  ;;  %p656_p11 = scmp.lt.s32.totalorder %s647_s18, %s647_s18 }
   0x6   : > { %p548_p4 = pneg %p706_p2 }
   0x7   : > { %p657_p12 = por %p656_p11, %p655_p10 }
   0x8   : > { %p549_p5 = pnand %p552_p3, %p548_p4 }
   0xa   : > { %p649_p7 = pneg %p549_p5 }
   0xc   : > { %p650_p8 = pnand %p649_p7, %p648_p6 }
   0xe   : > { %p651_p9 = pneg %p650_p8 }
  0x10   : > { %p658_p13 = pnand %p657_p12, %p651_p9 }
  0x12   : > { %661 = shalt.err (!%p658_p13)
}
  0x13   : > { %s674_s19 = smov [#allocation2]   ;;  %150 = sbr.rel (%p706_p2) target bundleno = 100 (0x64), region = 32 }
  0x14   : > { %551 = dma.vmem_to_smem (!%p549_p5), %s127_s16, 64, %s674_s19, [#allocation3]  }
  0x18   : > { %667 = dma.done.wait (%p552_p3), [#allocation3], 64  }
  0x19   : > { %669 = vsyncadd (%p552_p3), [#allocation3], 4294967232 }
  0x1a   : > { %156 = sfence }
  0x1b   : > { %p175_p0 = scmp.lt.s32.totalorder %s496_s13, 1  ;;  %s743_s24 = sld [smem:[#allocation2]]  ;;  %v264_v33 = vlaneseq }
  0x1c   : > { %s745_s25 = sld [smem:[#allocation2 + $0x1]] }
  0x1d   : > { %s830_s13 = smov (!%p175_p0, %s496_s13), 1  ;;  %s747_s26 = sld [smem:[#allocation2 + $0x80]]  ;;  %vm758_vm0 = vcmp.lt.s32.totalorder %v264_v33, 256 }
  0x1e   : > { %s543_s20 = smul.u32 96, %s830_s13  ;;  %s749_s27 = sld [smem:[#allocation2 + $0x81]] }
  0x1f   : > { %s751_s28 = sld [smem:[#allocation2 + $0x100]] }
  0x20   : > { %s725_s23 = scalar_lea.vmem %s824_s2, %s543_s20  ;;  %s753_s29 = sld [smem:[#allocation2 + $0x101]] }
  0x21   : > { %v186_v0 = vld [vmem:[%s725_s23] sm:$0x3]  ;;  %v187_v1 = vld [vmem:[%s725_s23 + $0x8] sm:$0x3]  ;;  %v325_v23 = vld [vmem:[%s725_s23] sm:$0xf0]  ;;  %v262_v44 = vstv %s743_s24  ;;  %s770_s5 = scalar_lea.vmem %s825_s3, %s543_s20 }
  0x22   : > { %v188_v2 = vld [vmem:[%s725_s23 + $0x20] sm:$0x3]  ;;  %v505_v3 = vmul.f32 -1.442695, %v186_v0  ;;  %v506_v4 = vmul.f32 -1.442695, %v187_v1  ;;  %v276_v49 = vstv %s745_s25 }
  0x23   : > { %v507_v5 = vmul.f32 -1.442695, %v188_v2  ;;  %v189_v6 = vld [vmem:[%s725_s23 + $0x28] sm:$0x3]  ;;  %v190_v7 = vld [vmem:[%s725_s23 + $0x40] sm:$0x3]  ;;  %v287_v54 = vstv %s747_s26 }
  0x24   : > { %v191_v8 = vld [vmem:[%s725_s23 + $0x48] sm:$0x3]  ;;  %563 = vpow2.f32 %v505_v3  ;;  %v508_v9 = vmul.f32 -1.442695, %v189_v6  ;;  %v509_v10 = vmul.f32 -1.442695, %v190_v7  ;;  %v298_v59 = vstv %s749_s27 }
  0x25   : > { %v510_v11 = vmul.f32 -1.442695, %v191_v8  ;;  %565 = vpow2.f32 %v506_v4  ;;  %v512_v12 = vld [vmem:[%s725_s23 + $0x2] ss:$8 sm:$0x3]  ;;  %v309_v0 = vstv %s751_s28 }
  0x26   : > { %v514_v13 = vld [vmem:[%s725_s23 + $0x3] ss:$8 sm:$0x3]  ;;  %567 = vpow2.f32 %v507_v5  ;;  %v259_v14 = vmul.f32 1.442695, %v512_v12  ;;  %v320_v4 = vstv %s753_s29 }
  0x27   : > { %v273_v15 = vmul.f32 1.442695, %v514_v13  ;;  %569 = vpow2.f32 %v508_v9  ;;  %v517_v16 = vld [vmem:[%s725_s23 + $0x22] ss:$8 sm:$0x3] }
  0x28   : > { %v520_v17 = vld [vmem:[%s725_s23 + $0x23] ss:$8 sm:$0x3]  ;;  %571 = vpow2.f32 %v509_v10  ;;  %v284_v18 = vmul.f32 1.442695, %v517_v16 }
  0x29   : > { %v295_v19 = vmul.f32 1.442695, %v520_v17  ;;  %573 = vpow2.f32 %v510_v11  ;;  %v523_v20 = vld [vmem:[%s725_s23 + $0x42] ss:$8 sm:$0x3] }
  0x2a   : > { %v526_v21 = vld [vmem:[%s725_s23 + $0x43] ss:$8 sm:$0x3]  ;;  %575 = vpow2.f32 %v259_v14  ;;  %v306_v22 = vmul.f32 1.442695, %v523_v20 }
  0x2b   : > { %577 = vpow2.f32 %v273_v15  ;;  %v317_v24 = vmul.f32 1.442695, %v526_v21  ;;  %v326_v25 = vld [vmem:[%s725_s23 + $0x8] sm:$0xf0]  ;;  %v327_v26 = vld [vmem:[%s725_s23 + $0x10] sm:$0x1] }
  0x2c   : > { %579 = vpow2.f32 %v284_v18  ;;  %v529_v27 = vmul.f32 -1.442695, %v325_v23  ;;  %v328_v28 = vld [vmem:[%s725_s23 + $0x18] sm:$0x1]  ;;  %v530_v29 = vmul.f32 -1.442695, %v326_v25 }
  0x2d   : > { %581 = vpow2.f32 %v295_v19  ;;  %v531_v30 = vmul.f32 -1.442695, %v327_v26  ;;  %v532_v31 = vmul.f32 -1.442695, %v328_v28  ;;  %v329_v38 = vld [vmem:[%s725_s23 + $0x20] sm:$0xf0] }
  0x2e   : > { %583 = vpow2.f32 %v306_v22  ;;  %v330_v41 = vld [vmem:[%s725_s23 + $0x28] sm:$0xf0]  ;;  %v331_v46 = vld [vmem:[%s725_s23 + $0x30] sm:$0x1]  ;;  %v533_v50 = vmul.f32 -1.442695, %v329_v38 }
  0x2f   : > { %585 = vpow2.f32 %v317_v24  ;;  %v332_v51 = vld [vmem:[%s725_s23 + $0x38] sm:$0x1]  ;;  %v534_v55 = vmul.f32 -1.442695, %v330_v41  ;;  %v333_v56 = vld [vmem:[%s725_s23 + $0x40] sm:$0xf0] }
  0x30   : > { %587 = vpow2.f32 %v529_v27  ;;  %v535_v60 = vmul.f32 -1.442695, %v331_v46  ;;  %v334_v61 = vld [vmem:[%s725_s23 + $0x48] sm:$0xf0]  ;;  %v536_v1 = vmul.f32 -1.442695, %v332_v51 }
  0x31   : > { %v564_v32 = vpop.eup %563  ;;  %589 = vpow2.f32 %v530_v29  ;;  %v537_v5 = vmul.f32 -1.442695, %v333_v56  ;;  %v538_v8 = vmul.f32 -1.442695, %v334_v61  ;;  %v335_v14 = vld [vmem:[%s725_s23 + $0x50] sm:$0x1] }
  0x32   : > { %v566_v34 = vpop.eup %565  ;;  %v210_v35 = vadd.f32 1.0, %v564_v32  ;;  %591 = vpow2.f32 %v531_v30  ;;  %v511_v10 = vld.sshfl [vmem:[%s823_s1] sm:$0x33 pattern:$0x76325410] }
  0x33   : > { %v568_v36 = vpop.eup %567  ;;  %v211_v37 = vadd.f32 1.0, %v566_v34  ;;  %593 = vpow2.f32 %v532_v31  ;;  %v336_v17 = vld [vmem:[%s725_s23 + $0x58] sm:$0x1]  ;;  %v236_v19 = vcombine.high %v511_v10, %v511_v10  ;;  %v539_v23 = vmul.f32 -1.442695, %v335_v14 }
  0x34   : > { %v570_v39 = vpop.eup %569  ;;  %595 = vrcp.f32 %v210_v35  ;;  %v212_v40 = vadd.f32 1.0, %v568_v36  ;;  %v540_v26 = vmul.f32 -1.442695, %v336_v17 }
  0x35   : > { %v572_v42 = vpop.eup %571  ;;  %597 = vrcp.f32 %v211_v37  ;;  %v213_v43 = vadd.f32 1.0, %v570_v39 }
  0x36   : > { %v574_v47 = vpop.eup %573  ;;  %599 = vrcp.f32 %v212_v40  ;;  %v214_v48 = vadd.f32 1.0, %v572_v42 }
  0x37   : > { %v576_v52 = vpop.eup %575  ;;  %601 = vrcp.f32 %v213_v43  ;;  %v215_v53 = vadd.f32 1.0, %v574_v47 }
  0x38   : > { %v578_v57 = vpop.eup %577  ;;  %603 = vrcp.f32 %v214_v48  ;;  %v263_v58 = vmul.f32 %v576_v52, %v262_v44 }
  0x39   : > { %v580_v62 = vpop.eup %579  ;;  %605 = vrcp.f32 %v215_v53  ;;  %v277_v63 = vmul.f32 %v578_v57, %v276_v49 }
  0x3a   : > { %v582_v2 = vpop.eup %581  ;;  %513 = vst.msk [vmem:[%s770_s5 + $0x2] ss:$8 sm:$0x3] %vm758_vm0, %v263_v58  ;;  %v288_v3 = vmul.f32 %v580_v62, %v287_v54  ;;  %607 = vpow2.f32 %v533_v50 }
  0x3b   : > { %v584_v6 = vpop.eup %583  ;;  %516 = vst.msk [vmem:[%s770_s5 + $0x3] ss:$8 sm:$0x3] %vm758_vm0, %v277_v63  ;;  %v299_v7 = vmul.f32 %v582_v2, %v298_v59  ;;  %609 = vpow2.f32 %v534_v55 }
  0x3c   : > { %v586_v9 = vpop.eup %585  ;;  %519 = vst.msk [vmem:[%s770_s5 + $0x22] ss:$8 sm:$0x3] %vm758_vm0, %v288_v3  ;;  %v310_v11 = vmul.f32 %v584_v6, %v309_v0  ;;  %611 = vpow2.f32 %v535_v60 }
  0x3d   : > { %v588_v12 = vpop.eup %587  ;;  %522 = vst.msk [vmem:[%s770_s5 + $0x23] ss:$8 sm:$0x3] %vm758_vm0, %v299_v7  ;;  %v321_v13 = vmul.f32 %v586_v9, %v320_v4  ;;  %613 = vpow2.f32 %v536_v1 }
  0x3e   : > { %v590_v15 = vpop.eup %589  ;;  %525 = vst.msk [vmem:[%s770_s5 + $0x42] ss:$8 sm:$0x3] %vm758_vm0, %v310_v11  ;;  %v373_v16 = vadd.f32 1.0, %v588_v12  ;;  %615 = vpow2.f32 %v537_v5 }
  0x3f   : > { %v592_v18 = vpop.eup %591  ;;  %528 = vst.msk [vmem:[%s770_s5 + $0x43] ss:$8 sm:$0x3] %vm758_vm0, %v321_v13  ;;  %v374_v20 = vadd.f32 1.0, %v590_v15  ;;  %617 = vpow2.f32 %v538_v8 }
  0x40   : > { %v594_v21 = vpop.eup %593  ;;  %619 = vrcp.f32 %v373_v16  ;;  %v375_v22 = vadd.f32 1.0, %v592_v18 }
  0x41   : > { %v596_v24 = vpop.eup %595  ;;  %621 = vrcp.f32 %v374_v20  ;;  %v376_v25 = vadd.f32 1.0, %v594_v21 }
  0x42   : > { %v598_v27 = vpop.eup %597  ;;  %v239_v28 = vadd.f32 %v596_v24, %v511_v10  ;;  %623 = vrcp.f32 %v375_v22 }
  0x43   : > { %v600_v29 = vpop.eup %599  ;;  %v240_v30 = vadd.f32 %v598_v27, %v236_v19  ;;  %625 = vrcp.f32 %v376_v25 }
  0x44   : > { %v602_v31 = vpop.eup %601  ;;  %v245_v32 = vmul.f32 4.0, %v239_v28  ;;  %v241_v33 = vadd.f32 %v600_v29, %v511_v10  ;;  %627 = vpow2.f32 %v539_v23 }
  0x45   : > { %v604_v34 = vpop.eup %603  ;;  %v246_v35 = vmul.f32 4.0, %v240_v30  ;;  %v242_v36 = vadd.f32 %v602_v31, %v236_v19  ;;  %629 = vpow2.f32 %v540_v26 }
  0x46   : > { %v606_v37 = vpop.eup %605  ;;  %251 = vst [vmem:[%s770_s5] sm:$0x3] %v245_v32  ;;  %v247_v38 = vmul.f32 4.0, %v241_v33  ;;  %v243_v39 = vadd.f32 %v604_v34, %v511_v10 }
  0x47   : > { %v608_v40 = vpop.eup %607  ;;  %252 = vst [vmem:[%s770_s5 + $0x8] sm:$0x3] %v246_v35  ;;  %v248_v41 = vmul.f32 4.0, %v242_v36  ;;  %v244_v42 = vadd.f32 %v606_v37, %v236_v19 }
  0x48   : > { %v610_v43 = vpop.eup %609  ;;  %253 = vst [vmem:[%s770_s5 + $0x20] sm:$0x3] %v247_v38  ;;  %v249_v44 = vmul.f32 4.0, %v243_v39  ;;  %v377_v45 = vadd.f32 1.0, %v608_v40 }
  0x49   : > { %v612_v46 = vpop.eup %611  ;;  %254 = vst [vmem:[%s770_s5 + $0x28] sm:$0x3] %v248_v41  ;;  %v250_v47 = vmul.f32 4.0, %v244_v42  ;;  %v378_v48 = vadd.f32 1.0, %v610_v43 }
  0x4a   : > { %v614_v49 = vpop.eup %613  ;;  %255 = vst [vmem:[%s770_s5 + $0x40] sm:$0x3] %v249_v44  ;;  %631 = vrcp.f32 %v377_v45  ;;  %v379_v50 = vadd.f32 1.0, %v612_v46 }
  0x4b   : > { %v616_v51 = vpop.eup %615  ;;  %256 = vst [vmem:[%s770_s5 + $0x48] sm:$0x3] %v250_v47  ;;  %633 = vrcp.f32 %v378_v48  ;;  %v380_v52 = vadd.f32 1.0, %v614_v49 }
  0x4c   : > { %v618_v53 = vpop.eup %617  ;;  %635 = vrcp.f32 %v379_v50  ;;  %v381_v54 = vadd.f32 1.0, %v616_v51 }
  0x4d   : > { %v620_v55 = vpop.eup %619  ;;  %637 = vrcp.f32 %v380_v52  ;;  %v382_v56 = vadd.f32 1.0, %v618_v53 }
  0x4e   : > { %v622_v57 = vpop.eup %621  ;;  %409 = vst [vmem:[%s770_s5] sm:$0xf0] %v620_v55  ;;  %639 = vrcp.f32 %v381_v54 }
  0x4f   : > { %v624_v58 = vpop.eup %623  ;;  %410 = vst [vmem:[%s770_s5 + $0x8] sm:$0xf0] %v622_v57  ;;  %641 = vrcp.f32 %v382_v56 }
  0x50   : > { %v626_v59 = vpop.eup %625  ;;  %411 = vst [vmem:[%s770_s5 + $0x10] sm:$0x1] %v624_v58 }
  0x51   : > { %v628_v60 = vpop.eup %627  ;;  %412 = vst [vmem:[%s770_s5 + $0x18] sm:$0x1] %v626_v59 }
  0x52   : > { %v630_v61 = vpop.eup %629  ;;  %v383_v62 = vadd.f32 1.0, %v628_v60 }
  0x53   : > { %v384_v63 = vadd.f32 1.0, %v630_v61 }
  0x54   : > { %643 = vrcp.f32 %v383_v62 }
  0x55   : > { %645 = vrcp.f32 %v384_v63 }
  0x57   : > { %v632_v0 = vpop.eup %631 }
  0x58   : > { %v634_v1 = vpop.eup %633  ;;  %413 = vst [vmem:[%s770_s5 + $0x20] sm:$0xf0] %v632_v0 }
  0x59   : > { %v636_v2 = vpop.eup %635  ;;  %414 = vst [vmem:[%s770_s5 + $0x28] sm:$0xf0] %v634_v1 }
  0x5a   : > { %v638_v3 = vpop.eup %637  ;;  %415 = vst [vmem:[%s770_s5 + $0x30] sm:$0x1] %v636_v2 }
  0x5b   : > { %v640_v4 = vpop.eup %639  ;;  %416 = vst [vmem:[%s770_s5 + $0x38] sm:$0x1] %v638_v3 }
  0x5c   : > { %v642_v5 = vpop.eup %641  ;;  %417 = vst [vmem:[%s770_s5 + $0x40] sm:$0xf0] %v640_v4 }
  0x5d   : > { %418 = vst [vmem:[%s770_s5 + $0x48] sm:$0xf0] %v642_v5 }
  0x61   : > { %v644_v6 = vpop.eup %643 }
  0x62   : > { %v646_v7 = vpop.eup %645  ;;  %419 = vst [vmem:[%s770_s5 + $0x50] sm:$0x1] %v644_v6 }
  0x63   : > { %420 = vst [vmem:[%s770_s5 + $0x58] sm:$0x1] %v646_v7 }
  0x64 PF: > { %s14_s12 = sadd.s32 1, %s672_s12  }
  0x65   : > { %p11_p1 = scmp.ge.s32.totalorder %s14_s12, 4  }
  0x67   :  { %13 = sbr.rel (!%p11_p1) target bundleno = 1 (0x1), region = 83 }
  0x6c   :  { %442 = vsyncpa [#allocation3], 1 }
  0x6d   :  { %444 = vsyncpa [#allocation3 + $0x1], 1 }

</bundles_post_ra>
